<compile_context>
chip_gen: v6e
topology: v6e:2x2x1
jax: 0.10.0
libtpu: 0.0.40
codegen_flags: <defaults>
</compile_context>

<pallas_src>
import functools
import math

import jax
import jax.numpy as jnp
from jax import lax
from jax.experimental import pallas as pl
from jax.experimental.pallas import tpu as pltpu

COMPUTE_DTYPE = jnp.bfloat16   # MXU input dtype (f32 accumulation); good on v5e/v6e/v7x
ACT_DTYPE = jnp.bfloat16       # dtype of activations / im2col patches between layers
ROW_ALIGN = 16                 # sublane alignment for row tiles (covers bf16 packing)
VMEM_LIMIT = 48 * 1024 * 1024  # scoped-VMEM cap: > v5e 16 MiB default, < v7x 64 MiB phys


def _round_up(x, m):
    return (x + m - 1) // m * m


def _pick_row_tiling(m, block_m):
    """Row padding + tile size.

    Divisor-friendly (pads <= ROW_ALIGN-ish rows instead of a full tile) and yields
    >= 2 row tiles whenever possible so "parallel" can shard across v7x's two TCs.
    """
    mp = _round_up(max(m, ROW_ALIGN), ROW_ALIGN)
    n_tiles = pl.cdiv(mp, block_m)
    if mp >= 2 * ROW_ALIGN:
        n_tiles = max(n_tiles, 2)
    tm = _round_up(pl.cdiv(mp, n_tiles), ROW_ALIGN)
    mp = _round_up(mp, tm)
    return mp, tm


# ---------------------------------------------------------------------------
# Pallas kernels
# ---------------------------------------------------------------------------
def _matmul_bias_act_kernel(x_ref, w_ref, b_ref, o_ref, *, apply_relu):
    # x: [tm, K] bf16, w: [K, N] bf16 (pre-cast at init), b: [1, N] f32 -> o: [tm, N]
    y = jnp.dot(x_ref[...], w_ref[...], preferred_element_type=jnp.float32)
    y = y + b_ref[...]                      # bias/ReLU epilogue in f32
    if apply_relu:
        y = jnp.maximum(y, 0.0)
    o_ref[...] = y.astype(o_ref.dtype)


def matmul_bias_act(x, w, b, *, apply_relu, out_dtype, block_m=256):
    """relu?(x @ w + b) as one Pallas kernel, tiled over rows; weights VMEM-resident."""
    M, K = x.shape
    N = w.shape[1]
    Mp, tm = _pick_row_tiling(M, block_m)
    if Mp != M:
        x = jnp.pad(x, ((0, Mp - M), (0, 0)))
    kernel = functools.partial(_matmul_bias_act_kernel, apply_relu=apply_relu)
    out = pl.pallas_call(
        kernel,
        out_shape=jax.ShapeDtypeStruct((Mp, N), out_dtype),
        grid=(Mp // tm,),
        in_specs=[
            pl.BlockSpec((tm, K), lambda i: (i, 0)),   # activation rows: tiled + pipelined
            pl.BlockSpec((K, N), lambda i: (0, 0)),    # weights: VMEM-resident bf16
            pl.BlockSpec((1, N), lambda i: (0, 0)),    # bias: loaded once (f32)
        ],
        out_specs=pl.BlockSpec((tm, N), lambda i: (i, 0)),
        compiler_params=pltpu.CompilerParams(
            dimension_semantics=("parallel",),
            vmem_limit_bytes=VMEM_LIMIT),
    )(x, w, b)
    return out[:M]


def _fused_mlp_kernel(*refs, relu_flags):
    # refs = (x_ref, w0, b0, w1, b1, ..., o_ref); layer loop unrolled statically.
    x_ref, o_ref = refs[0], refs[-1]
    h = x_ref[...]                           # bf16 on entry
    for li, relu in enumerate(relu_flags):
        w = refs[1 + 2 * li][...]            # bf16 (pre-cast at init)
        b = refs[2 + 2 * li][...]            # f32
        h = jnp.dot(h.astype(w.dtype), w, preferred_element_type=jnp.float32) + b
        if relu:
            h = jnp.maximum(h, 0.0)
    o_ref[...] = h.astype(o_ref.dtype)


def fused_mlp(x, layers, *, block_m=256):
    """Whole MLP head (Linear -> ReLU -> ... -> Linear) as ONE pallas_call.

    layers: list of (W [Din, Dout] bf16, b [1, Dout] f32, apply_relu); intermediate
    activations stay in VMEM, only the (lane-padded) Q-values are written to HBM.
    """
    M, K = x.shape
    n_out = layers[-1][0].shape[1]
    Mp, tm = _pick_row_tiling(M, block_m)
    if Mp != M:
        x = jnp.pad(x, ((0, Mp - M), (0, 0)))

    operands = [x]
    in_specs = [pl.BlockSpec((tm, K), lambda i: (i, 0))]
    relu_flags = []
    for w, b, relu in layers:
        operands += [w, b]
        in_specs += [pl.BlockSpec(w.shape, lambda i: (0, 0)),   # VMEM-resident weights
                     pl.BlockSpec(b.shape, lambda i: (0, 0))]
        relu_flags.append(relu)

    kernel = functools.partial(_fused_mlp_kernel, relu_flags=tuple(relu_flags))
    out = pl.pallas_call(
        kernel,
        out_shape=jax.ShapeDtypeStruct((Mp, n_out), jnp.float32),
        grid=(Mp // tm,),
        in_specs=in_specs,
        out_specs=pl.BlockSpec((tm, n_out), lambda i: (i, 0)),
        compiler_params=pltpu.CompilerParams(
            dimension_semantics=("parallel",),
            vmem_limit_bytes=VMEM_LIMIT),
    )(*operands)
    return out[:M]


# ---------------------------------------------------------------------------
# Conv layer = im2col (layout, wrapper side, kept in bf16) + fused Pallas matmul
# ---------------------------------------------------------------------------
def _conv2d_output_shape(h, w, k, s, p):
    return (h + 2 * p - k) // s + 1, (w + 2 * p - k) // s + 1


def _im2col(x_nhwc, k, s, p):
    """[B,H,W,C] -> ([B*OH*OW, k*k*C], OH, OW). Pure layout work; stays in ACT_DTYPE."""
    if p > 0:
        x_nhwc = jnp.pad(x_nhwc, ((0, 0), (p, p), (p, p), (0, 0)))
    B, Hp, Wp, C = x_nhwc.shape
    OH = (Hp - k) // s + 1
    OW = (Wp - k) // s + 1
    cols = []
    for i in range(k):
        for j in range(k):
            cols.append(x_nhwc[:, i:i + (OH - 1) * s + 1:s,
                                  j:j + (OW - 1) * s + 1:s, :])
    patches = jnp.concatenate(cols, axis=-1)            # [B, OH, OW, k*k*C]
    return patches.reshape(B * OH * OW, k * k * C), OH, OW


def conv2d_relu_pallas(x_nhwc, w_mat, b, *, k, s, p):
    # TODO(synk): conv2/conv3 feature maps fit in VMEM, so the k*k patches could be
    # built in-kernel (and conv2+conv3 fused into one pallas_call) to remove the
    # im2col HBM expansion and two launches; not yet implemented here.
    B = x_nhwc.shape[0]
    patches, OH, OW = _im2col(x_nhwc, k, s, p)
    y = matmul_bias_act(patches, w_mat, b, apply_relu=True, out_dtype=ACT_DTYPE)
    return y.reshape(B, OH, OW, w_mat.shape[1])


# ---------------------------------------------------------------------------
# Parameters (torch default init: U[-1/sqrt(fan_in), 1/sqrt(fan_in)])
# ---------------------------------------------------------------------------
def init_atari_dqn_params(key, image_shape, output_size, fc_sizes=512,
                          channels=(32, 64, 64), kernel_sizes=(8, 4, 3),
                          strides=(4, 2, 1), paddings=(0, 1, 1)):
    c, h, w = image_shape
    conv_layers = []   # (W_mat [k*k*Cin, Cout] bf16, b [1,Cout] f32, k, s, p)  Pallas
    conv_ref = []      # (W_hwio f32, b f32, s, p)                              lax ref
    in_c = c
    first = True
    for oc, k, s, p in zip(channels, kernel_sizes, strides, paddings):
        key, kw_key, kb_key = jax.random.split(key, 3)
        bound = 1.0 / math.sqrt(in_c * k * k)
        w_hwio = jax.random.uniform(kw_key, (k, k, in_c, oc), jnp.float32, -bound, bound)
        b = jax.random.uniform(kb_key, (1, oc), jnp.float32, -bound, bound)
        w_mat = w_hwio.reshape(k * k * in_c, oc)
        if first:
            # Fold 1/255 uint8->[0,1] scaling into conv1's weights so the image can be
            # fed as exact bf16 integers with no per-element multiply in the kernel.
            w_mat = w_mat * (1.0 / 255.0)
            first = False
        # NOTE: conv Cout (32/64) intentionally NOT zero-padded to 128 lanes (would
        # inflate HBM bytes of conv outputs / next-layer patches 4x/2x; layers are
        # HBM-bound and the vst count would be unchanged).
        conv_layers.append((w_mat.astype(COMPUTE_DTYPE), b, k, s, p))
        conv_ref.append((w_hwio, b, s, p))
        h, w = _conv2d_output_shape(h, w, k, s, p)
        in_c = oc
    conv_out_size = h * w * in_c

    if isinstance(fc_sizes, int):
        fc_sizes = [fc_sizes]
    fc_layers, fc_ref = [], []
    sizes_in = [conv_out_size] + list(fc_sizes)
    sizes_out = list(fc_sizes) + [output_size]
    n_fc = len(sizes_out)
    for li, (n_in, n_out) in enumerate(zip(sizes_in, sizes_out)):
        key, kw_key, kb_key = jax.random.split(key, 3)
        bound = 1.0 / math.sqrt(n_in)
        W = jax.random.uniform(kw_key, (n_in, n_out), jnp.float32, -bound, bound)
        b = jax.random.uniform(kb_key, (1, n_out), jnp.float32, -bound, bound)
        last = li == n_fc - 1
        fc_ref.append((W, b, not last))
        if last:
            # Lane-dense Q output: zero-pad Dout -> multiple of 128 (unmasked stores);
            # the forward wrapper slices back to `output_size`.
            n_pad = _round_up(n_out, 128)
            W = jnp.pad(W, ((0, 0), (0, n_pad - n_out)))
            b = jnp.pad(b, ((0, 0), (0, n_pad - n_out)))
        fc_layers.append((W.astype(COMPUTE_DTYPE), b, not last))
    return {"conv": conv_layers, "fc": fc_layers,
            "conv_ref": conv_ref, "fc_ref": fc_ref,
            "output_size": output_size}


# ---------------------------------------------------------------------------
# Full forward pass (uint8 images -> Q-values), with leading-dim handling
# ---------------------------------------------------------------------------
def atari_dqn_forward(observation, params):
    # uint8 -> bf16 is exact (ints <= 255); the 1/255 scale lives in conv1's weights,
    # so no f32 image and no f32 im2col patches are ever materialized in HBM.
    img = observation.astype(ACT_DTYPE)
    lead_dim = img.ndim - 3
    assert lead_dim in (0, 1, 2)
    if lead_dim == 2:
        T, B = img.shape[0], img.shape[1]
    elif lead_dim == 1:
        T, B = 1, img.shape[0]
    else:
        T, B = 1, 1
    C, H, W = img.shape[lead_dim:]
    x = jnp.transpose(img.reshape(T * B, C, H, W), (0, 2, 3, 1))   # NCHW -> NHWC

    for (w_mat, b, k, s, p) in params["conv"]:
        x = conv2d_relu_pallas(x, w_mat, b, k=k, s=s, p=p)

    # Features flattened in NHWC order (fixed permutation of torch's NCHW flatten;
    # equivalent parameterization since fc1 weights are defined in this ordering).
    flat = x.reshape(T * B, -1)
    q = fused_mlp(flat, params["fc"])[:, :params["output_size"]]

    if lead_dim == 2:
        q = q.reshape(T, B, -1)
    elif lead_dim == 0:
        q = q.reshape(-1)
    return q


def atari_dqn_reference(observation, params):
    """Pure-JAX f32 reference (lax.conv + dense chain) with the module's semantics."""
    img = observation.astype(jnp.float32) / 255.0
    lead_dim = img.ndim - 3
    if lead_dim == 2:
        T, B = img.shape[0], img.shape[1]
    elif lead_dim == 1:
        T, B = 1, img.shape[0]
    else:
        T, B = 1, 1
    C, H, W = img.shape[lead_dim:]
    x = jnp.transpose(img.reshape(T * B, C, H, W), (0, 2, 3, 1))
    for (w_hwio, b, s, p) in params["conv_ref"]:
        x = lax.conv_general_dilated(x, w_hwio, window_strides=(s, s),
                                     padding=[(p, p), (p, p)],
                                     dimension_numbers=("NHWC", "HWIO", "NHWC"))
        x = jnp.maximum(x + b.reshape(1, 1, 1, -1), 0.0)
    h = x.reshape(T * B, -1)
    for (w, b, relu) in params["fc_ref"]:
        h = h @ w + b
        if relu:
            h = jnp.maximum(h, 0.0)
    q = h
    if lead_dim == 2:
        q = q.reshape(T, B, -1)
    elif lead_dim == 0:
        q = q.reshape(-1)
    return q


if __name__ == "__main__":
    key = jax.random.PRNGKey(0)

    # Small shapes consistent with the module: uint8 frames [B, C, H, W].
    B = 2
    image_shape = (4, 20, 20)    # (c, h, w); conv stack: 20 -> 4 -> 2 -> 2
    output_size = 6              # number of actions

    key, k_obs, k_par = jax.random.split(key, 3)
    obs = jax.random.randint(k_obs, (B,) + image_shape, 0, 256,
                             dtype=jnp.int32).astype(jnp.uint8)
    params = init_atari_dqn_params(k_par, image_shape, output_size)

    fwd = jax.jit(lambda o: atari_dqn_forward(o, params))
    q = jax.block_until_ready(fwd(obs))
    assert q.shape == (B, output_size)

    # bf16 weights/activations (f32 accumulation) vs. an f32 reference -> loose tol.
    q_ref = jax.block_until_ready(atari_dqn_reference(obs, params))
    err = float(jnp.max(jnp.abs(q - q_ref)))
    assert jnp.allclose(q, q_ref, atol=2e-2, rtol=2e-2), f"max abs err {err}"

    # Leading-dims handling: [T, B, C, H, W] input -> [T, B, A] output.
    q_tb = jax.block_until_ready(jax.jit(lambda o: atari_dqn_forward(o, params))(obs[None]))
    assert q_tb.shape == (1, B, output_size)
    assert jnp.allclose(q_tb[0], q, atol=2e-2, rtol=2e-2)

    print("KERNEL_OK")
</pallas_src>

<mosaic_0001>
module attributes {stable_mosaic.version = 11 : i64} {
  func.func @_matmul_bias_act_kernel(%arg0: i32, %arg1: memref<16x256xbf16, #tpu.memory_space<vmem>>, %arg2: memref<256x32xbf16, #tpu.memory_space<vmem>>, %arg3: memref<1x32xf32, #tpu.memory_space<vmem>>, %arg4: memref<16x32xbf16, #tpu.memory_space<vmem>>) attributes {dimension_semantics = [#tpu.dimension_semantics<parallel>], iteration_bounds = array<i64: 2>, scalar_prefetch = 0 : i64, scratch_operands = 0 : i64, tpu.core_type = #tpu.core_type<tc>, window_params = [{transform_indices = @transform_0, window_bounds = array<i64: 16, 256>}, {pipeline_mode = #tpu.pipeline_mode<synchronous>, transform_indices = @transform_1, window_bounds = array<i64: 256, 32>}, {pipeline_mode = #tpu.pipeline_mode<synchronous>, transform_indices = @transform_2, window_bounds = array<i64: 1, 32>}, {transform_indices = @transform_3, window_bounds = array<i64: 16, 32>}]} {
    %c0 = arith.constant 0 : index
    %c0_0 = arith.constant 0 : index
    %0 = vector.load %arg1[%c0, %c0_0] : memref<16x256xbf16, #tpu.memory_space<vmem>>, vector<16x256xbf16>
    %c0_1 = arith.constant 0 : index
    %c0_2 = arith.constant 0 : index
    %1 = vector.load %arg2[%c0_1, %c0_2] : memref<256x32xbf16, #tpu.memory_space<vmem>>, vector<256x32xbf16>
    %cst = arith.constant dense<0.000000e+00> : vector<16x32xf32>
    %2 = tpu.matmul %0, %1, %cst {dimension_numbers = #tpu.dot_dimension_numbers<[1], [0], [0], [1], [0, 0, 1, 1], [], []>} : vector<16x256xbf16>, vector<256x32xbf16>, vector<16x32xf32> -> vector<16x32xf32>
    %c0_3 = arith.constant 0 : index
    %c0_4 = arith.constant 0 : index
    %3 = vector.load %arg3[%c0_3, %c0_4] : memref<1x32xf32, #tpu.memory_space<vmem>>, vector<1x32xf32>
    %4 = vector.broadcast %3 : vector<1x32xf32> to vector<16x32xf32>
    %5 = arith.addf %2, %4 : vector<16x32xf32>
    %cst_5 = arith.constant 0.000000e+00 : f32
    %6 = vector.broadcast %cst_5 : f32 to vector<16x32xf32>
    %7 = arith.maximumf %5, %6 : vector<16x32xf32>
    %8 = arith.truncf %7 : vector<16x32xf32> to vector<16x32xbf16>
    %c0_6 = arith.constant 0 : index
    %c0_7 = arith.constant 0 : index
    %9 = vector.load %arg4[%c0_6, %c0_7] : memref<16x32xbf16, #tpu.memory_space<vmem>>, vector<16x32xbf16>
    tpu.vector_store %arg4[%c0_6, %c0_7], %8 {strides = array<i32>} : memref<16x32xbf16, #tpu.memory_space<vmem>>, vector<16x32xbf16>,
    return
  }
  func.func @transform_0(%arg0: i32) -> (i32, i32) {
    %c0_i32 = arith.constant 0 : i32
    %c0_i32_0 = arith.constant 0 : i32
    return %arg0, %c0_i32 : i32, i32
  }
  func.func @transform_1(%arg0: i32) -> (i32, i32) {
    %c0_i32 = arith.constant 0 : i32
    %c0_i32_0 = arith.constant 0 : i32
    %c0_i32_1 = arith.constant 0 : i32
    return %c0_i32, %c0_i32_0 : i32, i32
  }
  func.func @transform_2(%arg0: i32) -> (i32, i32) {
    %c0_i32 = arith.constant 0 : i32
    %c0_i32_0 = arith.constant 0 : i32
    %c0_i32_1 = arith.constant 0 : i32
    return %c0_i32, %c0_i32_0 : i32, i32
  }
  func.func @transform_3(%arg0: i32) -> (i32, i32) {
    %c0_i32 = arith.constant 0 : i32
    %c0_i32_0 = arith.constant 0 : i32
    return %arg0, %c0_i32 : i32, i32
  }
}

module attributes {stable_mosaic.version = 11 : i64} {
  func.func @_matmul_bias_act_kernel(%arg0: i32, %arg1: memref<16x512xbf16, #tpu.memory_space<vmem>>, %arg2: memref<512x64xbf16, #tpu.memory_space<vmem>>, %arg3: memref<1x64xf32, #tpu.memory_space<vmem>>, %arg4: memref<16x64xbf16, #tpu.memory_space<vmem>>) attributes {dimension_semantics = [#tpu.dimension_semantics<parallel>], iteration_bounds = array<i64: 1>, scalar_prefetch = 0 : i64, scratch_operands = 0 : i64, tpu.core_type = #tpu.core_type<tc>, window_params = [{transform_indices = @transform_0, window_bounds = array<i64: 16, 512>}, {pipeline_mode = #tpu.pipeline_mode<synchronous>, transform_indices = @transform_1, window_bounds = array<i64: 512, 64>}, {pipeline_mode = #tpu.pipeline_mode<synchronous>, transform_indices = @transform_2, window_bounds = array<i64: 1, 64>}, {transform_indices = @transform_3, window_bounds = array<i64: 16, 64>}]} {
    %c0 = arith.constant 0 : index
    %c0_0 = arith.constant 0 : index
    %0 = vector.load %arg1[%c0, %c0_0] : memref<16x512xbf16, #tpu.memory_space<vmem>>, vector<16x512xbf16>
    %c0_1 = arith.constant 0 : index
    %c0_2 = arith.constant 0 : index
    %1 = vector.load %arg2[%c0_1, %c0_2] : memref<512x64xbf16, #tpu.memory_space<vmem>>, vector<512x64xbf16>
    %cst = arith.constant dense<0.000000e+00> : vector<16x64xf32>
    %2 = tpu.matmul %0, %1, %cst {dimension_numbers = #tpu.dot_dimension_numbers<[1], [0], [0], [1], [0, 0, 1, 1], [], []>} : vector<16x512xbf16>, vector<512x64xbf16>, vector<16x64xf32> -> vector<16x64xf32>
    %c0_3 = arith.constant 0 : index
    %c0_4 = arith.constant 0 : index
    %3 = vector.load %arg3[%c0_3, %c0_4] : memref<1x64xf32, #tpu.memory_space<vmem>>, vector<1x64xf32>
    %4 = vector.broadcast %3 : vector<1x64xf32> to vector<16x64xf32>
    %5 = arith.addf %2, %4 : vector<16x64xf32>
    %cst_5 = arith.constant 0.000000e+00 : f32
    %6 = vector.broadcast %cst_5 : f32 to vector<16x64xf32>
    %7 = arith.maximumf %5, %6 : vector<16x64xf32>
    %8 = arith.truncf %7 : vector<16x64xf32> to vector<16x64xbf16>
    %c0_6 = arith.constant 0 : index
    %c0_7 = arith.constant 0 : index
    %9 = vector.load %arg4[%c0_6, %c0_7] : memref<16x64xbf16, #tpu.memory_space<vmem>>, vector<16x64xbf16>
    tpu.vector_store %arg4[%c0_6, %c0_7], %8 {strides = array<i32>} : memref<16x64xbf16, #tpu.memory_space<vmem>>, vector<16x64xbf16>,
    return
  }
  func.func @transform_0(%arg0: i32) -> (i32, i32) {
    %c0_i32 = arith.constant 0 : i32
    %c0_i32_0 = arith.constant 0 : i32
    return %arg0, %c0_i32 : i32, i32
  }
  func.func @transform_1(%arg0: i32) -> (i32, i32) {
    %c0_i32 = arith.constant 0 : i32
    %c0_i32_0 = arith.constant 0 : i32
    %c0_i32_1 = arith.constant 0 : i32
    return %c0_i32, %c0_i32_0 : i32, i32
  }
  func.func @transform_2(%arg0: i32) -> (i32, i32) {
    %c0_i32 = arith.constant 0 : i32
    %c0_i32_0 = arith.constant 0 : i32
    %c0_i32_1 = arith.constant 0 : i32
    return %c0_i32, %c0_i32_0 : i32, i32
  }
  func.func @transform_3(%arg0: i32) -> (i32, i32) {
    %c0_i32 = arith.constant 0 : i32
    %c0_i32_0 = arith.constant 0 : i32
    return %arg0, %c0_i32 : i32, i32
  }
}

module attributes {stable_mosaic.version = 11 : i64} {
  func.func @_matmul_bias_act_kernel(%arg0: i32, %arg1: memref<16x576xbf16, #tpu.memory_space<vmem>>, %arg2: memref<576x64xbf16, #tpu.memory_space<vmem>>, %arg3: memref<1x64xf32, #tpu.memory_space<vmem>>, %arg4: memref<16x64xbf16, #tpu.memory_space<vmem>>) attributes {dimension_semantics = [#tpu.dimension_semantics<parallel>], iteration_bounds = array<i64: 1>, scalar_prefetch = 0 : i64, scratch_operands = 0 : i64, tpu.core_type = #tpu.core_type<tc>, window_params = [{transform_indices = @transform_0, window_bounds = array<i64: 16, 576>}, {pipeline_mode = #tpu.pipeline_mode<synchronous>, transform_indices = @transform_1, window_bounds = array<i64: 576, 64>}, {pipeline_mode = #tpu.pipeline_mode<synchronous>, transform_indices = @transform_2, window_bounds = array<i64: 1, 64>}, {transform_indices = @transform_3, window_bounds = array<i64: 16, 64>}]} {
    %c0 = arith.constant 0 : index
    %c0_0 = arith.constant 0 : index
    %0 = vector.load %arg1[%c0, %c0_0] : memref<16x576xbf16, #tpu.memory_space<vmem>>, vector<16x576xbf16>
    %c0_1 = arith.constant 0 : index
    %c0_2 = arith.constant 0 : index
    %1 = vector.load %arg2[%c0_1, %c0_2] : memref<576x64xbf16, #tpu.memory_space<vmem>>, vector<576x64xbf16>
    %cst = arith.constant dense<0.000000e+00> : vector<16x64xf32>
    %2 = tpu.matmul %0, %1, %cst {dimension_numbers = #tpu.dot_dimension_numbers<[1], [0], [0], [1], [0, 0, 1, 1], [], []>} : vector<16x576xbf16>, vector<576x64xbf16>, vector<16x64xf32> -> vector<16x64xf32>
    %c0_3 = arith.constant 0 : index
    %c0_4 = arith.constant 0 : index
    %3 = vector.load %arg3[%c0_3, %c0_4] : memref<1x64xf32, #tpu.memory_space<vmem>>, vector<1x64xf32>
    %4 = vector.broadcast %3 : vector<1x64xf32> to vector<16x64xf32>
    %5 = arith.addf %2, %4 : vector<16x64xf32>
    %cst_5 = arith.constant 0.000000e+00 : f32
    %6 = vector.broadcast %cst_5 : f32 to vector<16x64xf32>
    %7 = arith.maximumf %5, %6 : vector<16x64xf32>
    %8 = arith.truncf %7 : vector<16x64xf32> to vector<16x64xbf16>
    %c0_6 = arith.constant 0 : index
    %c0_7 = arith.constant 0 : index
    %9 = vector.load %arg4[%c0_6, %c0_7] : memref<16x64xbf16, #tpu.memory_space<vmem>>, vector<16x64xbf16>
    tpu.vector_store %arg4[%c0_6, %c0_7], %8 {strides = array<i32>} : memref<16x64xbf16, #tpu.memory_space<vmem>>, vector<16x64xbf16>,
    return
  }
  func.func @transform_0(%arg0: i32) -> (i32, i32) {
    %c0_i32 = arith.constant 0 : i32
    %c0_i32_0 = arith.constant 0 : i32
    return %arg0, %c0_i32 : i32, i32
  }
  func.func @transform_1(%arg0: i32) -> (i32, i32) {
    %c0_i32 = arith.constant 0 : i32
    %c0_i32_0 = arith.constant 0 : i32
    %c0_i32_1 = arith.constant 0 : i32
    return %c0_i32, %c0_i32_0 : i32, i32
  }
  func.func @transform_2(%arg0: i32) -> (i32, i32) {
    %c0_i32 = arith.constant 0 : i32
    %c0_i32_0 = arith.constant 0 : i32
    %c0_i32_1 = arith.constant 0 : i32
    return %c0_i32, %c0_i32_0 : i32, i32
  }
  func.func @transform_3(%arg0: i32) -> (i32, i32) {
    %c0_i32 = arith.constant 0 : i32
    %c0_i32_0 = arith.constant 0 : i32
    return %arg0, %c0_i32 : i32, i32
  }
}

module attributes {stable_mosaic.version = 11 : i64} {
  func.func @_fused_mlp_kernel(%arg0: i32, %arg1: memref<16x256xbf16, #tpu.memory_space<vmem>>, %arg2: memref<256x512xbf16, #tpu.memory_space<vmem>>, %arg3: memref<1x512xf32, #tpu.memory_space<vmem>>, %arg4: memref<512x128xbf16, #tpu.memory_space<vmem>>, %arg5: memref<1x128xf32, #tpu.memory_space<vmem>>, %arg6: memref<16x128xf32, #tpu.memory_space<vmem>>) attributes {dimension_semantics = [#tpu.dimension_semantics<parallel>], iteration_bounds = array<i64: 1>, scalar_prefetch = 0 : i64, scratch_operands = 0 : i64, tpu.core_type = #tpu.core_type<tc>, window_params = [{transform_indices = @transform_0, window_bounds = array<i64: 16, 256>}, {pipeline_mode = #tpu.pipeline_mode<synchronous>, transform_indices = @transform_1, window_bounds = array<i64: 256, 512>}, {pipeline_mode = #tpu.pipeline_mode<synchronous>, transform_indices = @transform_2, window_bounds = array<i64: 1, 512>}, {pipeline_mode = #tpu.pipeline_mode<synchronous>, transform_indices = @transform_3, window_bounds = array<i64: 512, 128>}, {pipeline_mode = #tpu.pipeline_mode<synchronous>, transform_indices = @transform_4, window_bounds = array<i64: 1, 128>}, {transform_indices = @transform_5, window_bounds = array<i64: 16, 128>}]} {
    %c0 = arith.constant 0 : index
    %c0_0 = arith.constant 0 : index
    %0 = vector.load %arg1[%c0, %c0_0] : memref<16x256xbf16, #tpu.memory_space<vmem>>, vector<16x256xbf16>
    %c0_1 = arith.constant 0 : index
    %c0_2 = arith.constant 0 : index
    %1 = vector.load %arg2[%c0_1, %c0_2] : memref<256x512xbf16, #tpu.memory_space<vmem>>, vector<256x512xbf16>
    %c0_3 = arith.constant 0 : index
    %c0_4 = arith.constant 0 : index
    %2 = vector.load %arg3[%c0_3, %c0_4] : memref<1x512xf32, #tpu.memory_space<vmem>>, vector<1x512xf32>
    %cst = arith.constant dense<0.000000e+00> : vector<16x512xf32>
    %3 = tpu.matmul %0, %1, %cst {dimension_numbers = #tpu.dot_dimension_numbers<[1], [0], [0], [1], [0, 0, 1, 1], [], []>} : vector<16x256xbf16>, vector<256x512xbf16>, vector<16x512xf32> -> vector<16x512xf32>
    %4 = vector.broadcast %2 : vector<1x512xf32> to vector<16x512xf32>
    %5 = arith.addf %3, %4 : vector<16x512xf32>
    %cst_5 = arith.constant 0.000000e+00 : f32
    %6 = vector.broadcast %cst_5 : f32 to vector<16x512xf32>
    %7 = arith.maximumf %5, %6 : vector<16x512xf32>
    %c0_6 = arith.constant 0 : index
    %c0_7 = arith.constant 0 : index
    %8 = vector.load %arg4[%c0_6, %c0_7] : memref<512x128xbf16, #tpu.memory_space<vmem>>, vector<512x128xbf16>
    %c0_8 = arith.constant 0 : index
    %c0_9 = arith.constant 0 : index
    %9 = vector.load %arg5[%c0_8, %c0_9] : memref<1x128xf32, #tpu.memory_space<vmem>>, vector<1x128xf32>
    %10 = arith.truncf %7 : vector<16x512xf32> to vector<16x512xbf16>
    %cst_10 = arith.constant dense<0.000000e+00> : vector<16x128xf32>
    %11 = tpu.matmul %10, %8, %cst_10 {dimension_numbers = #tpu.dot_dimension_numbers<[1], [0], [0], [1], [0, 0, 1, 1], [], []>} : vector<16x512xbf16>, vector<512x128xbf16>, vector<16x128xf32> -> vector<16x128xf32>
    %12 = vector.broadcast %9 : vector<1x128xf32> to vector<16x128xf32>
    %13 = arith.addf %11, %12 : vector<16x128xf32>
    %c0_11 = arith.constant 0 : index
    %c0_12 = arith.constant 0 : index
    %14 = vector.load %arg6[%c0_11, %c0_12] : memref<16x128xf32, #tpu.memory_space<vmem>>, vector<16x128xf32>
    tpu.vector_store %arg6[%c0_11, %c0_12], %13 {strides = array<i32>} : memref<16x128xf32, #tpu.memory_space<vmem>>, vector<16x128xf32>,
    return
  }
  func.func @transform_0(%arg0: i32) -> (i32, i32) {
    %c0_i32 = arith.constant 0 : i32
    %c0_i32_0 = arith.constant 0 : i32
    return %arg0, %c0_i32 : i32, i32
  }
  func.func @transform_1(%arg0: i32) -> (i32, i32) {
    %c0_i32 = arith.constant 0 : i32
    %c0_i32_0 = arith.constant 0 : i32
    %c0_i32_1 = arith.constant 0 : i32
    return %c0_i32, %c0_i32_0 : i32, i32
  }
  func.func @transform_2(%arg0: i32) -> (i32, i32) {
    %c0_i32 = arith.constant 0 : i32
    %c0_i32_0 = arith.constant 0 : i32
    %c0_i32_1 = arith.constant 0 : i32
    return %c0_i32, %c0_i32_0 : i32, i32
  }
  func.func @transform_3(%arg0: i32) -> (i32, i32) {
    %c0_i32 = arith.constant 0 : i32
    %c0_i32_0 = arith.constant 0 : i32
    %c0_i32_1 = arith.constant 0 : i32
    return %c0_i32, %c0_i32_0 : i32, i32
  }
  func.func @transform_4(%arg0: i32) -> (i32, i32) {
    %c0_i32 = arith.constant 0 : i32
    %c0_i32_0 = arith.constant 0 : i32
    %c0_i32_1 = arith.constant 0 : i32
    return %c0_i32, %c0_i32_0 : i32, i32
  }
  func.func @transform_5(%arg0: i32) -> (i32, i32) {
    %c0_i32 = arith.constant 0 : i32
    %c0_i32_0 = arith.constant 0 : i32
    return %arg0, %c0_i32 : i32, i32
  }
}

</mosaic_0001>

<bundles_post_ra>
// kernel: _lambda_.4
= control target key start
LH: loop header
LB: loop body
LE: loop exit
PB: predicated region body
PF: predicated region fallthrough
CT: control target
= control target key end

     0   :  { %s548_s12 = smov 0   ;;  %s620_s0 = inlined_call_operand.vmem [shape: bf16[32,256], index: 0, kind: input, shape index: {}]   ;;  %s621_s1 = inlined_call_operand.vmem [shape: bf16[256,32], index: 1, kind: input, shape index: {}]   ;;  %s622_s2 = inlined_call_operand.vmem [shape: f32[1,32], index: 2, kind: input, shape index: {}]   ;;  %s623_s3 = inlined_call_operand.vmem [shape: bf16[32,32], index: 3, kind: output, shape index: {}]  }
   0x1 LB: > { %s435_s13 = sadd.s32 4294967295, %s526_s12   ;;  %p439_p0 = scmp.ge.s32.totalorder %s526_s12, 1  ;;  %s526_s12 = sphi %s548_s12, %s13_s12  }
   0x2   : > { %p139_p1 = scmp.lt.s32.totalorder %s526_s12, 3 }
   0x4   : > { %p140_p2 = pnand %p439_p0, %p139_p1 }
   0x5   : > { %s440_s16 = sshll.u32 (!%p140_p2), %s435_s13, 1 }
   0x6   : > { %143 = sbr.rel (%p140_p2) target bundleno = 252 (0xfc), region = 32  ;;  %p165_p3 = scmp.lt.s32.totalorder (!%p140_p2), %s440_s16, 3 }
   0xb   : > { %v501_v0 = vld [vmem:[%s621_s1 + $0x78] sm:$0xff]   ;;  %v503_v2 = vld [vmem:[%s621_s1 + $0x70] sm:$0xff]   ;;  %v505_v4 = vld [vmem:[%s621_s1 + $0x68] sm:$0xff]   ;;  %s625_s16 = smov (!%p165_p3, %s440_s16), 3  ;;  %vm376_vm0 = vcmask 257024  }
   0xc   : > { %v502_v1 = vld [vmem:[%s621_s1 + $0x38] sm:$0xff]   ;;  %471 = vmatprep.subr.bf16.mxu0 %v501_v0  ;;  %v504_v3 = vld [vmem:[%s621_s1 + $0x30] sm:$0xff]   ;;  %v506_v5 = vld [vmem:[%s621_s1 + $0x28] sm:$0xff]   ;;  %s468_s4 = sshll.u32 %s625_s16, 3  ;;  %s444_s28 = sshll.u32 %s625_s16, 2 }
   0xd   : > { %472 = vmatpush3.bf16.msra.mxu0 %v502_v1  ;;  %v507_v6 = vld [vmem:[%s621_s1 + $0x60] sm:$0xff]   ;;  %v509_v8 = vld [vmem:[%s621_s1 + $0x58] sm:$0xff]   ;;  %s169_s9 = scalar_lea.vmem %s620_s0, %s468_s4  ;;  %v511_v10 = vld [vmem:[%s621_s1 + $0x50] sm:$0xff]   ;;  %s175_s4 = scalar_lea.vmem %s623_s3, %s444_s28 }
   0xe   : > { %473 = vmatprep.subr.bf16.mxu0 %v503_v2  ;;  %v508_v7 = vld [vmem:[%s621_s1 + $0x20] sm:$0xff]   ;;  %v510_v9 = vld [vmem:[%s621_s1 + $0x18] sm:$0xff]   ;;  %v512_v12 = vld [vmem:[%s621_s1 + $0x10] sm:$0xff]  }
   0xf   : > { %v519_v11 = vld [vmem:[%s169_s9 + $0x4] ss:$8 sps:$4 sm:$0xff]   ;;  %v517_v17 = vld [vmem:[%s169_s9] ss:$8 sps:$4 sm:$0xff]  }
  0x10   : > { %357 = vmatprep.mubr.bf16.mxu0 %v519_v11  ;;  %v513_v13 = vld [vmem:[%s621_s1 + $0x48] sm:$0xff]   ;;  %v515_v15 = vld [vmem:[%s621_s1 + $0x40] sm:$0xff]  }
  0x11   : > { %474 = vmatpush3.bf16.msra.mxu0 %v504_v3  ;;  %v514_v14 = vld [vmem:[%s621_s1 + $0x8] sm:$0xff]   ;;  %v516_v16 = vld [vmem:[%s621_s1] sm:$0xff]  }
  0x12   : > { %475 = vmatprep.subr.bf16.mxu0 %v505_v4  ;;  %v445_v19 = vld [vmem:[%s622_s2] ss:$0 sm:$0xff] }
  0x15   : > { %476 = vmatpush3.bf16.msra.mxu0 %v506_v5 }
  0x16   : > { %477 = vmatprep.subr.bf16.mxu0 %v507_v6 }
  0x19   : > { %478 = vmatpush3.bf16.msra.mxu0 %v508_v7 }
  0x1a   : > { %479 = vmatprep.subr.bf16.mxu0 %v509_v8 }
  0x1d   : > { %480 = vmatpush3.bf16.msra.mxu0 %v510_v9 }
  0x1e   : > { %481 = vmatprep.subr.bf16.mxu0 %v511_v10 }
  0x21   : > { %482 = vmatpush3.bf16.msra.mxu0 %v512_v12 }
  0x22   : > { %483 = vmatprep.subr.bf16.mxu0 %v513_v13 }
  0x25   : > { %484 = vmatpush3.bf16.msra.mxu0 %v514_v14 }
  0x26   : > { %485 = vmatprep.subr.bf16.mxu0 %v515_v15 }
  0x29   : > { %486 = vmatpush3.bf16.msra.mxu0 %v516_v16 }
  0x2c   : > { %358 = vmatmul.mubr.bf16.vlgmr.msra.gmra.mxu0 %v517_v17 }
  0xec   : > { %v487_v18 = vpop.f32.mrf.mxu0 }
  0xee   : > { %v488_v20 = vpop.f32.mrf.mxu0 }
  0xef   : > { %v489_v21 = vadd.f32 %v488_v20, %v487_v18 }
  0xf0   : > { %v490_v22 = vpop.f32.mrf.mxu0 }
  0xf1   : > { %v360_v23 = vadd.f32 %v489_v21, %v445_v19 }
  0xf2   : > { %v491_v24 = vpop.f32.mrf.mxu0 }
  0xf3   : > { %v366_v25 = vmax.f32 %v360_v23, 0.0  ;;  %v492_v26 = vadd.f32 %v491_v24, %v490_v22 }
  0xf5   : > { %v469_v27 = vpack.c.bf16 %v366_v25, %v366_v25  ;;  %v363_v28 = vadd.f32 %v492_v26, %v445_v19 }
  0xf7   : > { %377 = vst.msk [vmem:[%s175_s4] sm:$0xf] %vm376_vm0, %v469_v27  ;;  %v367_v29 = vmax.f32 %v363_v28, 0.0 }
  0xf9   : > { %v470_v30 = vpack.c.bf16 %v367_v29, %v367_v29 }
  0xfb   : > { %378 = vst.msk [vmem:[%s175_s4 + $0x4] sm:$0xf] %vm376_vm0, %v470_v30 }
  0xfc PF: > { %s13_s12 = sadd.s32 1, %s526_s12  }
  0xfd   : > { %p10_p4 = scmp.ge.s32.totalorder %s13_s12, 4  }
  0xff   :  { %12 = sbr.rel (!%p10_p4) target bundleno = 1 (0x1), region = 62 }

// kernel: _lambda_.5
= control target key start
LH: loop header
LB: loop body
LE: loop exit
PB: predicated region body
PF: predicated region fallthrough
CT: control target
= control target key end

     0   :  { %vm394_vm0 = vcmask 519168   ;;  %s661_s1 = inlined_call_operand.vmem [shape: bf16[512,64], index: 1, kind: input, shape index: {}]   ;;  %s662_s0 = inlined_call_operand.vmem [shape: bf16[16,512], index: 0, kind: input, shape index: {}]   ;;  %s663_s2 = inlined_call_operand.vmem [shape: f32[1,64], index: 2, kind: input, shape index: {}]   ;;  %s664_s3 = inlined_call_operand.vmem [shape: bf16[16,64], index: 3, kind: output, shape index: {}]  }
   0x1   :  { %v486_v0 = vld [vmem:[%s661_s1 + $0x78] sm:$0xff]   ;;  %v490_v4 = vld [vmem:[%s661_s1 + $0x70] sm:$0xff]   ;;  %v494_v8 = vld [vmem:[%s661_s1 + $0x68] sm:$0xff]  }
   0x2   :  { %v487_v1 = vld [vmem:[%s661_s1 + $0xf8] sm:$0xff]   ;;  %442 = vmatprep.subr.bf16.mxu0 %v486_v0  ;;  %v491_v5 = vld [vmem:[%s661_s1 + $0xf0] sm:$0xff]   ;;  %v495_v9 = vld [vmem:[%s661_s1 + $0xe8] sm:$0xff]  }
   0x3   :  { %v488_v2 = vld [vmem:[%s661_s1 + $0x38] sm:$0xff]   ;;  %464 = vmatprep.subr.bf16.mxu1 %v487_v1  ;;  %v492_v6 = vld [vmem:[%s661_s1 + $0x30] sm:$0xff]   ;;  %v496_v10 = vld [vmem:[%s661_s1 + $0x28] sm:$0xff]  }
   0x4   :  { %v489_v3 = vld [vmem:[%s661_s1 + $0xb8] sm:$0xff]   ;;  %443 = vmatpush3.bf16.msra.mxu0 %v488_v2  ;;  %v493_v7 = vld [vmem:[%s661_s1 + $0xb0] sm:$0xff]   ;;  %v497_v11 = vld [vmem:[%s661_s1 + $0xa8] sm:$0xff]  }
   0x5   :  { %465 = vmatpush3.bf16.msra.mxu1 %v489_v3  ;;  %444 = vmatprep.subr.bf16.mxu0 %v490_v4  ;;  %v498_v12 = vld [vmem:[%s661_s1 + $0x60] sm:$0xff]   ;;  %v502_v16 = vld [vmem:[%s661_s1 + $0x58] sm:$0xff]   ;;  %v506_v20 = vld [vmem:[%s661_s1 + $0x50] sm:$0xff]  }
   0x6   :  { %466 = vmatprep.subr.bf16.mxu1 %v491_v5  ;;  %v499_v13 = vld [vmem:[%s661_s1 + $0xe0] sm:$0xff]   ;;  %v503_v17 = vld [vmem:[%s661_s1 + $0xd8] sm:$0xff]   ;;  %v507_v21 = vld [vmem:[%s661_s1 + $0xd0] sm:$0xff]  }
   0x7   :  { %v500_v14 = vld [vmem:[%s661_s1 + $0x20] sm:$0xff]   ;;  %v504_v18 = vld [vmem:[%s661_s1 + $0x18] sm:$0xff]   ;;  %v508_v22 = vld [vmem:[%s661_s1 + $0x10] sm:$0xff]  }
   0x8   :  { %445 = vmatpush3.bf16.msra.mxu0 %v492_v6  ;;  %v501_v15 = vld [vmem:[%s661_s1 + $0xa0] sm:$0xff]   ;;  %v505_v19 = vld [vmem:[%s661_s1 + $0x98] sm:$0xff]   ;;  %v509_v23 = vld [vmem:[%s661_s1 + $0x90] sm:$0xff]  }
   0x9   :  { %467 = vmatpush3.bf16.msra.mxu1 %v493_v7  ;;  %446 = vmatprep.subr.bf16.mxu0 %v494_v8  ;;  %v510_v24 = vld [vmem:[%s661_s1 + $0x48] sm:$0xff]   ;;  %v514_v28 = vld [vmem:[%s661_s1 + $0x40] sm:$0xff]  }
   0xa   :  { %468 = vmatprep.subr.bf16.mxu1 %v495_v9  ;;  %v511_v25 = vld [vmem:[%s661_s1 + $0xc8] sm:$0xff]   ;;  %v515_v29 = vld [vmem:[%s661_s1 + $0xc0] sm:$0xff]  }
   0xb   :  { %v512_v26 = vld [vmem:[%s661_s1 + $0x8] sm:$0xff]   ;;  %v516_v30 = vld [vmem:[%s661_s1] sm:$0xff]  }
   0xc   :  { %447 = vmatpush3.bf16.msra.mxu0 %v496_v10  ;;  %v513_v27 = vld [vmem:[%s661_s1 + $0x88] sm:$0xff]   ;;  %v517_v31 = vld [vmem:[%s661_s1 + $0x80] sm:$0xff]  }
   0xd   :  { %469 = vmatpush3.bf16.msra.mxu1 %v497_v11  ;;  %448 = vmatprep.subr.bf16.mxu0 %v498_v12  ;;  %v518_v32 = vld [vmem:[%s662_s0] ss:$16 sps:$4 sm:$0xff]   ;;  %v520_v33 = vld [vmem:[%s662_s0 + $0x4] ss:$16 sps:$4 sm:$0xff]   ;;  %v521_v34 = vld [vmem:[%s662_s0 + $0x8] ss:$16 sps:$4 sm:$0xff]  }
   0xe   :  { %470 = vmatprep.subr.bf16.mxu1 %v499_v13  ;;  %v523_v35 = vld [vmem:[%s662_s0 + $0xc] ss:$16 sps:$4 sm:$0xff]   ;;  %334 = vmatprep.mubr.bf16.mxu0 %v520_v33  ;;  %v401_v38 = vld [vmem:[%s663_s2] ss:$0 sm:$0xff] }
   0xf   :  { %375 = vmatprep.mubr.bf16.mxu1 %v523_v35 }
  0x10   :  { %449 = vmatpush3.bf16.msra.mxu0 %v500_v14 }
  0x11   :  { %471 = vmatpush3.bf16.msra.mxu1 %v501_v15  ;;  %450 = vmatprep.subr.bf16.mxu0 %v502_v16 }
  0x12   :  { %472 = vmatprep.subr.bf16.mxu1 %v503_v17 }
  0x14   :  { %451 = vmatpush3.bf16.msra.mxu0 %v504_v18 }
  0x15   :  { %473 = vmatpush3.bf16.msra.mxu1 %v505_v19  ;;  %452 = vmatprep.subr.bf16.mxu0 %v506_v20 }
  0x16   :  { %474 = vmatprep.subr.bf16.mxu1 %v507_v21 }
  0x18   :  { %453 = vmatpush3.bf16.msra.mxu0 %v508_v22 }
  0x19   :  { %475 = vmatpush3.bf16.msra.mxu1 %v509_v23  ;;  %454 = vmatprep.subr.bf16.mxu0 %v510_v24 }
  0x1a   :  { %476 = vmatprep.subr.bf16.mxu1 %v511_v25 }
  0x1c   :  { %455 = vmatpush3.bf16.msra.mxu0 %v512_v26 }
  0x1d   :  { %477 = vmatpush3.bf16.msra.mxu1 %v513_v27  ;;  %456 = vmatprep.subr.bf16.mxu0 %v514_v28 }
  0x1e   :  { %478 = vmatprep.subr.bf16.mxu1 %v515_v29 }
  0x20   :  { %457 = vmatpush3.bf16.msra.mxu0 %v516_v30 }
  0x21   :  { %479 = vmatpush3.bf16.msra.mxu1 %v517_v31 }
  0x23   :  { %335 = vmatmul.mubr.bf16.vlgmr.msra.gmra.mxu0 %v518_v32 }
  0x24   :  { %376 = vmatmul.mubr.bf16.vlgmr.msra.gmra.mxu1 %v521_v34 }
  0xe3   :  { %v458_v36 = vpop.f32.mrf.mxu0 }
  0xe4   :  { %v480_v37 = vpop.f32.mrf.mxu1 }
  0xe5   :  { %v459_v39 = vpop.f32.mrf.mxu0 }
  0xe6   :  { %v460_v40 = vadd.f32 %v459_v39, %v458_v36  ;;  %v481_v41 = vpop.f32.mrf.mxu1 }
  0xe7   :  { %v461_v42 = vpop.f32.mrf.mxu0  ;;  %v482_v44 = vadd.f32 %v481_v41, %v480_v37 }
  0xe8   :  { %v337_v43 = vadd.f32 %v460_v40, %v401_v38  ;;  %v483_v45 = vpop.f32.mrf.mxu1 }
  0xe9   :  { %v462_v46 = vpop.f32.mrf.mxu0 }
  0xea   :  { %v378_v47 = vadd.f32 %v482_v44, %v337_v43  ;;  %v463_v48 = vadd.f32 %v462_v46, %v461_v42  ;;  %v484_v49 = vpop.f32.mrf.mxu1 }
  0xeb   :  { %v485_v52 = vadd.f32 %v484_v49, %v483_v45 }
  0xec   :  { %v384_v50 = vmax.f32 %v378_v47, 0.0  ;;  %v340_v51 = vadd.f32 %v463_v48, %v401_v38 }
  0xee   :  { %v440_v53 = vpack.c.bf16 %v384_v50, %v384_v50  ;;  %v381_v54 = vadd.f32 %v485_v52, %v340_v51 }
  0xf0   :  { %395 = vst.msk [vmem:[%s664_s3] sm:$0xf] %vm394_vm0, %v440_v53  ;;  %v385_v55 = vmax.f32 %v381_v54, 0.0 }
  0xf2   :  { %v441_v56 = vpack.c.bf16 %v385_v55, %v385_v55 }
  0xf4   :  { %396 = vst.msk [vmem:[%s664_s3 + $0x4] sm:$0xf] %vm394_vm0, %v441_v56 }

// kernel: _lambda_.6
= control target key start
LH: loop header
LB: loop body
LE: loop exit
PB: predicated region body
PF: predicated region fallthrough
CT: control target
= control target key end

     0   :  { %v638_v33 = vmov 0.0   ;;  %vm639_vm0 = vmmov 0   ;;  %vm341_vm1 = vcmask 523264   ;;  %vm478_vm2 = vcmask 519168   ;;  %s792_s1 = inlined_call_operand.vmem [shape: bf16[576,64], index: 1, kind: input, shape index: {}]   ;;  %s793_s0 = inlined_call_operand.vmem [shape: bf16[16,576], index: 0, kind: input, shape index: {}]   ;;  %s794_s2 = inlined_call_operand.vmem [shape: f32[1,64], index: 2, kind: input, shape index: {}]   ;;  %s795_s3 = inlined_call_operand.vmem [shape: bf16[16,64], index: 3, kind: output, shape index: {}]  }
   0x1   :  { %v595_v0 = vld [vmem:[%s792_s1 + $0x78] sm:$0xff]   ;;  %v599_v4 = vld [vmem:[%s792_s1 + $0x70] sm:$0xff]   ;;  %v603_v8 = vld [vmem:[%s792_s1 + $0x68] sm:$0xff]  }
   0x2   :  { %v596_v1 = vld [vmem:[%s792_s1 + $0x38] sm:$0xff]   ;;  %532 = vmatprep.subr.bf16.mxu0 %v595_v0  ;;  %v600_v5 = vld [vmem:[%s792_s1 + $0x30] sm:$0xff]   ;;  %v604_v9 = vld [vmem:[%s792_s1 + $0x28] sm:$0xff]  }
   0x3   :  { %v597_v2 = vld [vmem:[%s792_s1 + $0xf8] sm:$0xff]   ;;  %533 = vmatpush3.bf16.msra.mxu0 %v596_v1  ;;  %v601_v6 = vld [vmem:[%s792_s1 + $0xf0] sm:$0xff]   ;;  %v605_v10 = vld [vmem:[%s792_s1 + $0xe8] sm:$0xff]  }
   0x4   :  { %v598_v3 = vld [vmem:[%s792_s1 + $0xb8] sm:$0xff]   ;;  %554 = vmatprep.subr.bf16.mxu1 %v597_v2  ;;  %534 = vmatprep.subr.bf16.mxu0 %v599_v4  ;;  %v602_v7 = vld [vmem:[%s792_s1 + $0xb0] sm:$0xff]   ;;  %v606_v11 = vld [vmem:[%s792_s1 + $0xa8] sm:$0xff]  }
   0x5   :  { %555 = vmatpush3.bf16.msra.mxu1 %v598_v3  ;;  %v607_v12 = vld [vmem:[%s792_s1 + $0x60] sm:$0xff]   ;;  %v611_v16 = vld [vmem:[%s792_s1 + $0x58] sm:$0xff]   ;;  %v615_v20 = vld [vmem:[%s792_s1 + $0x50] sm:$0xff]  }
   0x6   :  { %556 = vmatprep.subr.bf16.mxu1 %v601_v6  ;;  %v608_v13 = vld [vmem:[%s792_s1 + $0x20] sm:$0xff]   ;;  %v612_v17 = vld [vmem:[%s792_s1 + $0x18] sm:$0xff]   ;;  %v616_v21 = vld [vmem:[%s792_s1 + $0x10] sm:$0xff]  }
   0x7   :  { %535 = vmatpush3.bf16.msra.mxu0 %v600_v5  ;;  %v609_v14 = vld [vmem:[%s792_s1 + $0xe0] sm:$0xff]   ;;  %v613_v18 = vld [vmem:[%s792_s1 + $0xd8] sm:$0xff]   ;;  %v617_v22 = vld [vmem:[%s792_s1 + $0xd0] sm:$0xff]  }
   0x8   :  { %536 = vmatprep.subr.bf16.mxu0 %v603_v8  ;;  %v610_v15 = vld [vmem:[%s792_s1 + $0xa0] sm:$0xff]   ;;  %v614_v19 = vld [vmem:[%s792_s1 + $0x98] sm:$0xff]   ;;  %v618_v23 = vld [vmem:[%s792_s1 + $0x90] sm:$0xff]  }
   0x9   :  { %557 = vmatpush3.bf16.msra.mxu1 %v602_v7  ;;  %v619_v24 = vld [vmem:[%s792_s1 + $0x48] sm:$0xff]   ;;  %v623_v28 = vld [vmem:[%s792_s1 + $0x40] sm:$0xff]   ;;  %v633_v37 = vld [vmem:[%s792_s1 + $0x118] sm:$0xff]  }
   0xa   :  { %558 = vmatprep.subr.bf16.mxu1 %v605_v10  ;;  %v620_v25 = vld [vmem:[%s792_s1 + $0x8] sm:$0xff]   ;;  %v624_v29 = vld [vmem:[%s792_s1] sm:$0xff]   ;;  %v634_v38 = vld [vmem:[%s792_s1 + $0x110] sm:$0xff]  }
   0xb   :  { %537 = vmatpush3.bf16.msra.mxu0 %v604_v9  ;;  %v621_v26 = vld [vmem:[%s792_s1 + $0xc8] sm:$0xff]   ;;  %v625_v30 = vld [vmem:[%s792_s1 + $0xc0] sm:$0xff]  }
   0xc   :  { %538 = vmatprep.subr.bf16.mxu0 %v607_v12  ;;  %v622_v27 = vld [vmem:[%s792_s1 + $0x88] sm:$0xff]   ;;  %v626_v31 = vld [vmem:[%s793_s0] ss:$20 sps:$4 sm:$0xff]   ;;  %v628_v32 = vld [vmem:[%s793_s0 + $0x4] ss:$20 sps:$4 sm:$0xff]  }
   0xd   :  { %559 = vmatpush3.bf16.msra.mxu1 %v606_v11  ;;  %v629_v34 = vld [vmem:[%s792_s1 + $0x80] sm:$0xff]   ;;  %377 = vmatprep.mubr.bf16.mxu0 %v628_v32  ;;  %v630_v35 = vld [vmem:[%s793_s0 + $0x8] ss:$20 sps:$4 sm:$0xff]  }
   0xe   :  { %560 = vmatprep.subr.bf16.mxu1 %v609_v14  ;;  %v632_v36 = vld [vmem:[%s793_s0 + $0xc] ss:$20 sps:$4 sm:$0xff]   ;;  %v637_v41 = vld [vmem:[%s793_s0 + $0x10] ss:$20 sps:$4 sm:$0xff]  }
   0xf   :  { %539 = vmatpush3.bf16.msra.mxu0 %v608_v13  ;;  %418 = vmatprep.mubr.bf16.mxu1 %v632_v36  ;;  %v635_v39 = vld [vmem:[%s792_s1 + $0x108] sm:$0xff]   ;;  %v636_v40 = vld [vmem:[%s792_s1 + $0x100] sm:$0xff]  }
  0x10   :  { %540 = vmatprep.subr.bf16.mxu0 %v611_v16  ;;  %v485_v48 = vld [vmem:[%s794_s2] ss:$0 sm:$0xff] }
  0x11   :  { %561 = vmatpush3.bf16.msra.mxu1 %v610_v15 }
  0x12   :  { %562 = vmatprep.subr.bf16.mxu1 %v613_v18 }
  0x13   :  { %541 = vmatpush3.bf16.msra.mxu0 %v612_v17 }
  0x14   :  { %542 = vmatprep.subr.bf16.mxu0 %v615_v20 }
  0x15   :  { %563 = vmatpush3.bf16.msra.mxu1 %v614_v19 }
  0x16   :  { %564 = vmatprep.subr.bf16.mxu1 %v617_v22 }
  0x17   :  { %543 = vmatpush3.bf16.msra.mxu0 %v616_v21 }
  0x18   :  { %544 = vmatprep.subr.bf16.mxu0 %v619_v24 }
  0x19   :  { %565 = vmatpush3.bf16.msra.mxu1 %v618_v23 }
  0x1a   :  { %566 = vmatprep.subr.bf16.mxu1 %v621_v26 }
  0x1b   :  { %545 = vmatpush3.bf16.msra.mxu0 %v620_v25 }
  0x1c   :  { %546 = vmatprep.subr.bf16.mxu0 %v623_v28 }
  0x1d   :  { %567 = vmatpush3.bf16.msra.mxu1 %v622_v27 }
  0x1e   :  { %568 = vmatprep.subr.bf16.mxu1 %v625_v30 }
  0x1f   :  { %547 = vmatpush3.bf16.msra.mxu0 %v624_v29 }
  0x20   :  { %581 = vmatprep.subr.bf16.mxu0 %v638_v33 }
  0x21   :  { %569 = vmatpush3.bf16.msra.mxu1 %v629_v34 }
  0x22   :  { %378 = vmatmul.mubr.bf16.vlgmr.msra.gmra.mxu0 %v626_v31 }
  0x23   :  { %589 = vmatprep.mubr.msk.bf16.mxu0 %vm639_vm0, %v638_v33  ;;  %582 = vmatpush3.bf16.msra.mxu0 %v633_v37 }
  0x24   :  { %419 = vmatmul.mubr.bf16.vlgmr.msra.gmra.mxu1 %v630_v35  ;;  %583 = vmatprep.subr.bf16.mxu0 %v638_v33 }
  0x27   :  { %584 = vmatpush3.bf16.msra.mxu0 %v634_v38 }
  0x28   :  { %585 = vmatprep.subr.bf16.mxu0 %v638_v33 }
  0x2b   :  { %586 = vmatpush3.bf16.msra.mxu0 %v635_v39 }
  0x2c   :  { %587 = vmatprep.subr.bf16.mxu0 %v638_v33 }
  0x2f   :  { %588 = vmatpush3.bf16.msra.mxu0 %v636_v40 }
  0x32   :  { %590 = vmatmul.mubr.msk.bf16.vlgmr.msra.gmra.mxu0 %vm341_vm1, %v637_v41 }
  0xe2   :  { %v548_v42 = vpop.f32.mrf.mxu0 }
  0xe4   :  { %v549_v43 = vpop.f32.mrf.mxu0  ;;  %v570_v44 = vpop.f32.mrf.mxu1 }
  0xe5   :  { %v550_v47 = vadd.f32 %v549_v43, %v548_v42 }
  0xe6   :  { %v551_v45 = vpop.f32.mrf.mxu0  ;;  %v571_v46 = vpop.f32.mrf.mxu1 }
  0xe7   :  { %v380_v51 = vadd.f32 %v550_v47, %v485_v48  ;;  %v572_v52 = vadd.f32 %v571_v46, %v570_v44 }
  0xe8   :  { %v552_v49 = vpop.f32.mrf.mxu0  ;;  %v573_v50 = vpop.f32.mrf.mxu1 }
  0xe9   :  { %v553_v53 = vadd.f32 %v552_v49, %v551_v45  ;;  %v421_v57 = vadd.f32 %v572_v52, %v380_v51 }
  0xea   :  { %v574_v54 = vpop.f32.mrf.mxu1 }
  0xeb   :  { %v383_v55 = vadd.f32 %v553_v53, %v485_v48  ;;  %v575_v56 = vadd.f32 %v574_v54, %v573_v50 }
  0xed   :  { %v424_v62 = vadd.f32 %v575_v56, %v383_v55 }
  0xf2   :  { %v461_v58 = vpop.f32.mrf.mxu0 }
  0xf3   :  { %v462_v59 = vadd.f32 %v461_v58, %v421_v57 }
  0xf4   :  { %v591_v60 = vpop.f32.mrf.mxu0 }
  0xf5   :  { %v468_v61 = vmax.f32 %v462_v59, 0.0 }
  0xf6   :  { %v464_v63 = vpop.f32.mrf.mxu0 }
  0xf7   :  { %v530_v0 = vpack.c.bf16 %v468_v61, %v468_v61  ;;  %v465_v1 = vadd.f32 %v464_v63, %v424_v62 }
  0xf8   :  { %v592_v2 = vpop.f32.mrf.mxu0 }
  0xf9   :  { %479 = vst.msk [vmem:[%s795_s3] sm:$0xf] %vm478_vm2, %v530_v0  ;;  %v469_v3 = vmax.f32 %v465_v1, 0.0 }
  0xfb   :  { %v531_v4 = vpack.c.bf16 %v469_v3, %v469_v3 }
  0xfd   :  { %480 = vst.msk [vmem:[%s795_s3 + $0x4] sm:$0xf] %vm478_vm2, %v531_v4 }

// kernel: _lambda_.7
= control target key start
LH: loop header
LB: loop body
LE: loop exit
PB: predicated region body
PF: predicated region fallthrough
CT: control target
= control target key end

     0   :  { %s1498_s1 = inlined_call_operand.vmem [shape: bf16[256,512], index: 1, kind: input, shape index: {}]   ;;  %s1499_s0 = inlined_call_operand.vmem [shape: bf16[16,256], index: 0, kind: input, shape index: {}]   ;;  %s1500_s3 = inlined_call_operand.vmem [shape: bf16[512,128], index: 3, kind: input, shape index: {}]   ;;  %s1501_s2 = inlined_call_operand.vmem [shape: f32[1,512], index: 2, kind: input, shape index: {}]   ;;  %s1502_s4 = inlined_call_operand.vmem [shape: f32[1,128], index: 4, kind: input, shape index: {}]   ;;  %s1503_s5 = inlined_call_operand.vmem [shape: f32[16,128], index: 5, kind: output, shape index: {}]  }
   0x1   :  { %v1031_v0 = vld [vmem:[%s1498_s1 + $0xe4] ss:$16 sps:$4 sm:$0xff]   ;;  %v1033_v1 = vld [vmem:[%s1498_s1 + $0xec] ss:$16 sps:$4 sm:$0xff]   ;;  %v1035_v2 = vld [vmem:[%s1498_s1 + $0xe0] ss:$16 sps:$4 sm:$0xff]  }
   0x2   :  { %439 = vmatprep.subr.bf16.mxu0 %v1031_v0  ;;  %v1036_v3 = vld [vmem:[%s1498_s1 + $0xe8] ss:$16 sps:$4 sm:$0xff]   ;;  %482 = vmatprep.subr.bf16.mxu1 %v1033_v1  ;;  %v1037_v4 = vld [vmem:[%s1498_s1 + $0xc4] ss:$16 sps:$4 sm:$0xff]   ;;  %v1039_v5 = vld [vmem:[%s1498_s1 + $0xcc] ss:$16 sps:$4 sm:$0xff]  }
   0x3   :  { %440 = vmatpush1.bf16.msra.mxu0 %v1035_v2  ;;  %483 = vmatpush1.bf16.msra.mxu1 %v1036_v3  ;;  %v1041_v6 = vld [vmem:[%s1498_s1 + $0xc0] ss:$16 sps:$4 sm:$0xff]   ;;  %v1042_v7 = vld [vmem:[%s1498_s1 + $0xc8] ss:$16 sps:$4 sm:$0xff]   ;;  %v1043_v8 = vld [vmem:[%s1498_s1 + $0xa4] ss:$16 sps:$4 sm:$0xff]  }
   0x4   :  { %441 = vmatprep.subr.bf16.mxu0 %v1037_v4  ;;  %484 = vmatprep.subr.bf16.mxu1 %v1039_v5  ;;  %v1045_v9 = vld [vmem:[%s1498_s1 + $0xac] ss:$16 sps:$4 sm:$0xff]   ;;  %v1047_v10 = vld [vmem:[%s1498_s1 + $0xa0] ss:$16 sps:$4 sm:$0xff]   ;;  %v1048_v11 = vld [vmem:[%s1498_s1 + $0xa8] ss:$16 sps:$4 sm:$0xff]  }
   0x5   :  { %v1049_v12 = vld [vmem:[%s1498_s1 + $0x84] ss:$16 sps:$4 sm:$0xff]   ;;  %v1051_v13 = vld [vmem:[%s1498_s1 + $0x8c] ss:$16 sps:$4 sm:$0xff]   ;;  %v1053_v14 = vld [vmem:[%s1498_s1 + $0x80] ss:$16 sps:$4 sm:$0xff]  }
   0x6   :  { %v1054_v15 = vld [vmem:[%s1498_s1 + $0x88] ss:$16 sps:$4 sm:$0xff]   ;;  %v1055_v16 = vld [vmem:[%s1498_s1 + $0x64] ss:$16 sps:$4 sm:$0xff]   ;;  %v1057_v17 = vld [vmem:[%s1498_s1 + $0x6c] ss:$16 sps:$4 sm:$0xff]  }
   0x7   :  { %442 = vmatpush1.bf16.msra.mxu0 %v1041_v6  ;;  %485 = vmatpush1.bf16.msra.mxu1 %v1042_v7  ;;  %v1059_v18 = vld [vmem:[%s1498_s1 + $0x60] ss:$16 sps:$4 sm:$0xff]   ;;  %v1060_v19 = vld [vmem:[%s1498_s1 + $0x68] ss:$16 sps:$4 sm:$0xff]   ;;  %v1061_v20 = vld [vmem:[%s1498_s1 + $0x44] ss:$16 sps:$4 sm:$0xff]  }
   0x8   :  { %443 = vmatprep.subr.bf16.mxu0 %v1043_v8  ;;  %486 = vmatprep.subr.bf16.mxu1 %v1045_v9  ;;  %v1063_v21 = vld [vmem:[%s1498_s1 + $0x4c] ss:$16 sps:$4 sm:$0xff]   ;;  %v1065_v22 = vld [vmem:[%s1498_s1 + $0x40] ss:$16 sps:$4 sm:$0xff]   ;;  %v1066_v23 = vld [vmem:[%s1498_s1 + $0x48] ss:$16 sps:$4 sm:$0xff]  }
   0x9   :  { %v1067_v24 = vld [vmem:[%s1498_s1 + $0x24] ss:$16 sps:$4 sm:$0xff]   ;;  %v1069_v25 = vld [vmem:[%s1498_s1 + $0x2c] ss:$16 sps:$4 sm:$0xff]   ;;  %v1071_v26 = vld [vmem:[%s1498_s1 + $0x20] ss:$16 sps:$4 sm:$0xff]  }
   0xa   :  { %v1072_v27 = vld [vmem:[%s1498_s1 + $0x28] ss:$16 sps:$4 sm:$0xff]   ;;  %v1073_v28 = vld [vmem:[%s1498_s1 + $0x4] ss:$16 sps:$4 sm:$0xff]   ;;  %v1075_v29 = vld [vmem:[%s1498_s1 + $0xc] ss:$16 sps:$4 sm:$0xff]  }
   0xb   :  { %444 = vmatpush1.bf16.msra.mxu0 %v1047_v10  ;;  %487 = vmatpush1.bf16.msra.mxu1 %v1048_v11  ;;  %v1077_v30 = vld [vmem:[%s1498_s1] ss:$16 sps:$4 sm:$0xff]   ;;  %v1078_v31 = vld [vmem:[%s1498_s1 + $0x8] ss:$16 sps:$4 sm:$0xff]   ;;  %v1079_v32 = vld [vmem:[%s1498_s1 + $0x1e4] ss:$16 sps:$4 sm:$0xff]  }
   0xc   :  { %445 = vmatprep.subr.bf16.mxu0 %v1049_v12  ;;  %488 = vmatprep.subr.bf16.mxu1 %v1051_v13  ;;  %v1081_v33 = vld [vmem:[%s1498_s1 + $0x1ec] ss:$16 sps:$4 sm:$0xff]   ;;  %v1083_v34 = vld [vmem:[%s1498_s1 + $0x1e0] ss:$16 sps:$4 sm:$0xff]   ;;  %v1084_v35 = vld [vmem:[%s1498_s1 + $0x1e8] ss:$16 sps:$4 sm:$0xff]  }
   0xd   :  { %v1085_v36 = vld [vmem:[%s1498_s1 + $0x1c4] ss:$16 sps:$4 sm:$0xff]   ;;  %v1087_v37 = vld [vmem:[%s1498_s1 + $0x1cc] ss:$16 sps:$4 sm:$0xff]   ;;  %v1089_v38 = vld [vmem:[%s1498_s1 + $0x1c0] ss:$16 sps:$4 sm:$0xff]  }
   0xe   :  { %v1090_v39 = vld [vmem:[%s1498_s1 + $0x1c8] ss:$16 sps:$4 sm:$0xff]   ;;  %v1091_v40 = vld [vmem:[%s1498_s1 + $0x1a4] ss:$16 sps:$4 sm:$0xff]   ;;  %v1093_v41 = vld [vmem:[%s1498_s1 + $0x1ac] ss:$16 sps:$4 sm:$0xff]  }
   0xf   :  { %446 = vmatpush1.bf16.msra.mxu0 %v1053_v14  ;;  %489 = vmatpush1.bf16.msra.mxu1 %v1054_v15  ;;  %v1095_v42 = vld [vmem:[%s1498_s1 + $0x1a0] ss:$16 sps:$4 sm:$0xff]   ;;  %v1096_v43 = vld [vmem:[%s1498_s1 + $0x1a8] ss:$16 sps:$4 sm:$0xff]   ;;  %v1097_v44 = vld [vmem:[%s1498_s1 + $0x184] ss:$16 sps:$4 sm:$0xff]  }
  0x10   :  { %447 = vmatprep.subr.bf16.mxu0 %v1055_v16  ;;  %490 = vmatprep.subr.bf16.mxu1 %v1057_v17  ;;  %v1099_v45 = vld [vmem:[%s1498_s1 + $0x18c] ss:$16 sps:$4 sm:$0xff]   ;;  %v1101_v46 = vld [vmem:[%s1498_s1 + $0x180] ss:$16 sps:$4 sm:$0xff]   ;;  %v1102_v47 = vld [vmem:[%s1498_s1 + $0x188] ss:$16 sps:$4 sm:$0xff]  }
  0x11   :  { %v1129_v48 = vld [vmem:[%s1499_s0 + $0x4] ss:$8 sps:$4 sm:$0xff]   ;;  %v1107_v51 = vld [vmem:[%s1498_s1 + $0x160] ss:$16 sps:$4 sm:$0xff]   ;;  %v1108_v52 = vld [vmem:[%s1498_s1 + $0x168] ss:$16 sps:$4 sm:$0xff]  }
  0x12   :  { %v1103_v49 = vld [vmem:[%s1498_s1 + $0x164] ss:$16 sps:$4 sm:$0xff]   ;;  %v1105_v50 = vld [vmem:[%s1498_s1 + $0x16c] ss:$16 sps:$4 sm:$0xff]   ;;  %471 = vmatprep.mubr.bf16.mxu0 %v1129_v48  ;;  %514 = vmatprep.mubr.bf16.mxu1 %v1129_v48  ;;  %v1113_v55 = vld [vmem:[%s1498_s1 + $0x140] ss:$16 sps:$4 sm:$0xff]  }
  0x13   :  { %448 = vmatpush1.bf16.msra.mxu0 %v1059_v18  ;;  %491 = vmatpush1.bf16.msra.mxu1 %v1060_v19  ;;  %v1109_v53 = vld [vmem:[%s1498_s1 + $0x144] ss:$16 sps:$4 sm:$0xff]   ;;  %v1111_v54 = vld [vmem:[%s1498_s1 + $0x14c] ss:$16 sps:$4 sm:$0xff]   ;;  %v1114_v56 = vld [vmem:[%s1498_s1 + $0x148] ss:$16 sps:$4 sm:$0xff]  }
  0x14   :  { %449 = vmatprep.subr.bf16.mxu0 %v1061_v20  ;;  %492 = vmatprep.subr.bf16.mxu1 %v1063_v21  ;;  %v1115_v57 = vld [vmem:[%s1498_s1 + $0x124] ss:$16 sps:$4 sm:$0xff]   ;;  %v1117_v58 = vld [vmem:[%s1498_s1 + $0x12c] ss:$16 sps:$4 sm:$0xff]   ;;  %v1119_v59 = vld [vmem:[%s1498_s1 + $0x120] ss:$16 sps:$4 sm:$0xff]  }
  0x15   :  { %v1120_v60 = vld [vmem:[%s1498_s1 + $0x128] ss:$16 sps:$4 sm:$0xff]   ;;  %v1121_v61 = vld [vmem:[%s1498_s1 + $0x104] ss:$16 sps:$4 sm:$0xff]   ;;  %v1123_v62 = vld [vmem:[%s1498_s1 + $0x10c] ss:$16 sps:$4 sm:$0xff]  }
  0x16   :  { %v1125_v63 = vld [vmem:[%s1498_s1 + $0x100] ss:$16 sps:$4 sm:$0xff]   ;;  %v1126_v0 = vld [vmem:[%s1498_s1 + $0x108] ss:$16 sps:$4 sm:$0xff]  }
  0x17   :  { %450 = vmatpush1.bf16.msra.mxu0 %v1065_v22  ;;  %493 = vmatpush1.bf16.msra.mxu1 %v1066_v23  ;;  %v1130_v1 = vld [vmem:[%s1500_s3 + $0x78] sm:$0xff]   ;;  %v1127_v2 = vld [vmem:[%s1499_s0] ss:$8 sps:$4 sm:$0xff]   ;;  %v1134_v6 = vld [vmem:[%s1500_s3 + $0x70] sm:$0xff]  }
  0x18   :  { %451 = vmatprep.subr.bf16.mxu0 %v1067_v24  ;;  %494 = vmatprep.subr.bf16.mxu1 %v1069_v25  ;;  %v1131_v3 = vld [vmem:[%s1500_s3 + $0xf8] sm:$0xff]   ;;  %v1135_v7 = vld [vmem:[%s1500_s3 + $0xf0] sm:$0xff]   ;;  %v1138_v10 = vld [vmem:[%s1500_s3 + $0x68] sm:$0xff]  }
  0x19   :  { %v1132_v4 = vld [vmem:[%s1500_s3 + $0x38] sm:$0xff]   ;;  %v1136_v8 = vld [vmem:[%s1500_s3 + $0x30] sm:$0xff]   ;;  %v1139_v11 = vld [vmem:[%s1500_s3 + $0xe8] sm:$0xff]  }
  0x1a   :  { %v1133_v5 = vld [vmem:[%s1500_s3 + $0xb8] sm:$0xff]   ;;  %v1137_v9 = vld [vmem:[%s1500_s3 + $0xb0] sm:$0xff]   ;;  %v1140_v12 = vld [vmem:[%s1500_s3 + $0x28] sm:$0xff]  }
  0x1b   :  { %452 = vmatpush1.bf16.msra.mxu0 %v1071_v26  ;;  %495 = vmatpush1.bf16.msra.mxu1 %v1072_v27  ;;  %v1141_v13 = vld [vmem:[%s1500_s3 + $0xa8] sm:$0xff]   ;;  %v1142_v14 = vld [vmem:[%s1500_s3 + $0x60] sm:$0xff]   ;;  %v1146_v18 = vld [vmem:[%s1500_s3 + $0x58] sm:$0xff]  }
  0x1c   :  { %453 = vmatprep.subr.bf16.mxu0 %v1073_v28  ;;  %496 = vmatprep.subr.bf16.mxu1 %v1075_v29  ;;  %v1143_v15 = vld [vmem:[%s1500_s3 + $0xe0] sm:$0xff]   ;;  %v1147_v19 = vld [vmem:[%s1500_s3 + $0xd8] sm:$0xff]   ;;  %v1150_v22 = vld [vmem:[%s1500_s3 + $0x50] sm:$0xff]  }
  0x1d   :  { %v1144_v16 = vld [vmem:[%s1500_s3 + $0x20] sm:$0xff]   ;;  %v1148_v20 = vld [vmem:[%s1500_s3 + $0x18] sm:$0xff]   ;;  %v1151_v23 = vld [vmem:[%s1500_s3 + $0xd0] sm:$0xff]  }
  0x1e   :  { %v1145_v17 = vld [vmem:[%s1500_s3 + $0xa0] sm:$0xff]   ;;  %v1149_v21 = vld [vmem:[%s1500_s3 + $0x98] sm:$0xff]   ;;  %v1152_v24 = vld [vmem:[%s1500_s3 + $0x10] sm:$0xff]  }
  0x1f   :  { %454 = vmatpush1.bf16.msra.mxu0 %v1077_v30  ;;  %497 = vmatpush1.bf16.msra.mxu1 %v1078_v31  ;;  %v1153_v25 = vld [vmem:[%s1500_s3 + $0x90] sm:$0xff]   ;;  %v1154_v26 = vld [vmem:[%s1500_s3 + $0x48] sm:$0xff]   ;;  %v1158_v30 = vld [vmem:[%s1500_s3 + $0x40] sm:$0xff]  }
  0x20   :  { %455 = vmatprep.subr.bf16.mxu0 %v1079_v32  ;;  %498 = vmatprep.subr.bf16.mxu1 %v1081_v33  ;;  %v1155_v27 = vld [vmem:[%s1500_s3 + $0xc8] sm:$0xff]   ;;  %v1159_v31 = vld [vmem:[%s1500_s3 + $0xc0] sm:$0xff]  }
  0x21   :  { %v1156_v28 = vld [vmem:[%s1500_s3 + $0x8] sm:$0xff]   ;;  %v1160_v32 = vld [vmem:[%s1500_s3] sm:$0xff]  }
  0x22   :  { %v1157_v29 = vld [vmem:[%s1500_s3 + $0x88] sm:$0xff]   ;;  %v1161_v33 = vld [vmem:[%s1500_s3 + $0x80] sm:$0xff]  }
  0x23   :  { %456 = vmatpush2.bf16.msra.mxu0 %v1083_v34  ;;  %499 = vmatpush2.bf16.msra.mxu1 %v1084_v35  ;;  %v89_v34 = vlaneseq }
  0x24   :  { %457 = vmatprep.subr.bf16.mxu0 %v1085_v36  ;;  %500 = vmatprep.subr.bf16.mxu1 %v1087_v37 }
  0x25   :  { %v90_v35 = vshrl.u32 %v89_v34, 7 }
  0x27   :  { %458 = vmatpush2.bf16.msra.mxu0 %v1089_v38  ;;  %501 = vmatpush2.bf16.msra.mxu1 %v1090_v39  ;;  %v95_v36 = vsub.s32 1, %v90_v35  ;;  %v103_v37 = vsub.s32 3, %v90_v35  ;;  %v91_v38 = vsub.s32 0, %v90_v35  ;;  %v99_v39 = vsub.s32 2, %v90_v35 }
  0x28   :  { %459 = vmatprep.subr.bf16.mxu0 %v1091_v40  ;;  %502 = vmatprep.subr.bf16.mxu1 %v1093_v41  ;;  %v87_v40 = vld [vmem:[%s1501_s2] sm:$0xf] }
  0x2b   :  { %460 = vmatpush2.bf16.msra.mxu0 %v1095_v42  ;;  %503 = vmatpush2.bf16.msra.mxu1 %v1096_v43  ;;  %v96_v43 = vrot.slane %v87_v40, %v95_v36 }
  0x2c   :  { %461 = vmatprep.subr.bf16.mxu0 %v1097_v44  ;;  %504 = vmatprep.subr.bf16.mxu1 %v1099_v45  ;;  %v104_v44 = vrot.slane %v87_v40, %v103_v37  ;;  %v92_v45 = vrot.slane %v87_v40, %v91_v38 }
  0x2f   :  { %462 = vmatpush2.bf16.msra.mxu0 %v1101_v46  ;;  %505 = vmatpush2.bf16.msra.mxu1 %v1102_v47  ;;  %v100_v46 = vrot.slane %v87_v40, %v99_v39 }
  0x30   :  { %463 = vmatprep.subr.bf16.mxu0 %v1103_v49  ;;  %506 = vmatprep.subr.bf16.mxu1 %v1105_v50 }
  0x33   :  { %464 = vmatpush2.bf16.msra.mxu0 %v1107_v51  ;;  %507 = vmatpush2.bf16.msra.mxu1 %v1108_v52 }
  0x34   :  { %465 = vmatprep.subr.bf16.mxu0 %v1109_v53  ;;  %508 = vmatprep.subr.bf16.mxu1 %v1111_v54 }
  0x37   :  { %466 = vmatpush2.bf16.msra.mxu0 %v1113_v55  ;;  %509 = vmatpush2.bf16.msra.mxu1 %v1114_v56 }
  0x38   :  { %467 = vmatprep.subr.bf16.mxu0 %v1115_v57  ;;  %510 = vmatprep.subr.bf16.mxu1 %v1117_v58 }
  0x3b   :  { %468 = vmatpush2.bf16.msra.mxu0 %v1119_v59  ;;  %511 = vmatpush2.bf16.msra.mxu1 %v1120_v60 }
  0x3c   :  { %469 = vmatprep.subr.bf16.mxu0 %v1121_v61  ;;  %512 = vmatprep.subr.bf16.mxu1 %v1123_v62 }
  0x3f   :  { %470 = vmatpush2.bf16.msra.mxu0 %v1125_v63  ;;  %513 = vmatpush2.bf16.msra.mxu1 %v1126_v0 }
  0x40   :  { %987 = vmatprep.subr.bf16.mxu0 %v1130_v1  ;;  %1009 = vmatprep.subr.bf16.mxu1 %v1131_v3 }
  0x42   :  { %472 = vmatmul.mubr.bf16.vlgmr.msra.gmra.mxu0 %v1127_v2  ;;  %515 = vmatmul.mubr.bf16.vlgmr.msra.gmra.mxu1 %v1127_v2 }
  0x43   :  { %988 = vmatpush3.bf16.msra.mxu0 %v1132_v4  ;;  %1010 = vmatpush3.bf16.msra.mxu1 %v1133_v5 }
  0x44   :  { %989 = vmatprep.subr.bf16.mxu0 %v1134_v6  ;;  %1011 = vmatprep.subr.bf16.mxu1 %v1135_v7 }
  0x47   :  { %990 = vmatpush3.bf16.msra.mxu0 %v1136_v8  ;;  %1012 = vmatpush3.bf16.msra.mxu1 %v1137_v9 }
  0x48   :  { %991 = vmatprep.subr.bf16.mxu0 %v1138_v10  ;;  %1013 = vmatprep.subr.bf16.mxu1 %v1139_v11  ;;  %v954_v11 = vld [vmem:[%s1502_s4] ss:$0 sm:$0xff] }
  0x4b   :  { %992 = vmatpush3.bf16.msra.mxu0 %v1140_v12  ;;  %1014 = vmatpush3.bf16.msra.mxu1 %v1141_v13 }
  0x4c   :  { %993 = vmatprep.subr.bf16.mxu0 %v1142_v14  ;;  %1015 = vmatprep.subr.bf16.mxu1 %v1143_v15 }
  0x4f   :  { %994 = vmatpush3.bf16.msra.mxu0 %v1144_v16  ;;  %1016 = vmatpush3.bf16.msra.mxu1 %v1145_v17 }
  0x50   :  { %995 = vmatprep.subr.bf16.mxu0 %v1146_v18  ;;  %1017 = vmatprep.subr.bf16.mxu1 %v1147_v19 }
  0x53   :  { %996 = vmatpush3.bf16.msra.mxu0 %v1148_v20  ;;  %1018 = vmatpush3.bf16.msra.mxu1 %v1149_v21 }
  0x54   :  { %997 = vmatprep.subr.bf16.mxu0 %v1150_v22  ;;  %1019 = vmatprep.subr.bf16.mxu1 %v1151_v23 }
  0x57   :  { %998 = vmatpush3.bf16.msra.mxu0 %v1152_v24  ;;  %1020 = vmatpush3.bf16.msra.mxu1 %v1153_v25 }
  0x58   :  { %999 = vmatprep.subr.bf16.mxu0 %v1154_v26  ;;  %1021 = vmatprep.subr.bf16.mxu1 %v1155_v27 }
  0x5b   :  { %1000 = vmatpush3.bf16.msra.mxu0 %v1156_v28  ;;  %1022 = vmatpush3.bf16.msra.mxu1 %v1157_v29 }
  0x5c   :  { %1001 = vmatprep.subr.bf16.mxu0 %v1158_v30  ;;  %1023 = vmatprep.subr.bf16.mxu1 %v1159_v31 }
  0x5f   :  { %1002 = vmatpush3.bf16.msra.mxu0 %v1160_v32  ;;  %1024 = vmatpush3.bf16.msra.mxu1 %v1161_v33 }
 0x102   :  { %v473_v41 = vpop.f32.mrf.mxu0  ;;  %v516_v42 = vpop.f32.mrf.mxu1 }
 0x103   :  { %v474_v55 = vadd.f32 %v473_v41, %v92_v45  ;;  %v517_v56 = vadd.f32 %v516_v42, %v100_v46 }
 0x104   :  { %v475_v47 = vpop.f32.mrf.mxu0  ;;  %v518_v48 = vpop.f32.mrf.mxu1 }
 0x105   :  { %v476_v51 = vadd.f32 %v475_v47, %v96_v43  ;;  %v519_v52 = vadd.f32 %v518_v48, %v104_v44  ;;  %v525_v3 = vmax.f32 %v474_v55, 0.0  ;;  %v527_v4 = vmax.f32 %v517_v56, 0.0 }
 0x106   :  { %v477_v49 = vpop.f32.mrf.mxu0  ;;  %v520_v50 = vpop.f32.mrf.mxu1 }
 0x107   :  { %v478_v53 = vadd.f32 %v477_v49, %v92_v45  ;;  %v521_v54 = vadd.f32 %v520_v50, %v100_v46  ;;  %v526_v63 = vmax.f32 %v476_v51, 0.0  ;;  %v528_v0 = vmax.f32 %v519_v52, 0.0 }
 0x108   :  { %v479_v57 = vpop.f32.mrf.mxu0  ;;  %v522_v58 = vpop.f32.mrf.mxu1 }
 0x109   :  { %v480_v59 = vadd.f32 %v479_v57, %v96_v43  ;;  %v523_v60 = vadd.f32 %v522_v58, %v104_v44  ;;  %v529_v61 = vmax.f32 %v478_v53, 0.0  ;;  %v531_v62 = vmax.f32 %v521_v54, 0.0 }
 0x10b   :  { %v530_v1 = vmax.f32 %v480_v59, 0.0  ;;  %v532_v2 = vmax.f32 %v523_v60, 0.0  ;;  %v598_v7 = vpack.c.bf16 %v529_v61, %v525_v3  ;;  %v600_v8 = vpack.c.bf16 %v531_v62, %v527_v4 }
 0x10d   :  { %v599_v5 = vpack.c.bf16 %v530_v1, %v526_v63  ;;  %v601_v6 = vpack.c.bf16 %v532_v2, %v528_v0 }
 0x10f   :  { %832 = vmatprep.mubr.bf16.mxu0 %v599_v5  ;;  %873 = vmatprep.mubr.bf16.mxu1 %v601_v6 }
 0x110   :  { %833 = vmatmul.mubr.bf16.vlgmr.msra.gmra.mxu0 %v598_v7  ;;  %874 = vmatmul.mubr.bf16.vlgmr.msra.gmra.mxu1 %v600_v8 }
 0x1d0   :  { %v1003_v9 = vpop.f32.mrf.mxu0  ;;  %v1025_v10 = vpop.f32.mrf.mxu1 }
 0x1d2   :  { %v1004_v12 = vpop.f32.mrf.mxu0  ;;  %v1026_v13 = vpop.f32.mrf.mxu1 }
 0x1d3   :  { %v1005_v14 = vadd.f32 %v1004_v12, %v1003_v9  ;;  %v1027_v18 = vadd.f32 %v1026_v13, %v1025_v10 }
 0x1d4   :  { %v1006_v15 = vpop.f32.mrf.mxu0  ;;  %v1028_v16 = vpop.f32.mrf.mxu1 }
 0x1d5   :  { %v835_v17 = vadd.f32 %v1005_v14, %v954_v11 }
 0x1d6   :  { %v1007_v19 = vpop.f32.mrf.mxu0  ;;  %v1029_v20 = vpop.f32.mrf.mxu1 }
 0x1d7   :  { %v876_v21 = vadd.f32 %v1027_v18, %v835_v17  ;;  %v1008_v22 = vadd.f32 %v1007_v19, %v1006_v15  ;;  %v1030_v24 = vadd.f32 %v1029_v20, %v1028_v16 }
 0x1d9   :  { %882 = vst [vmem:[%s1503_s5] sm:$0xff] %v876_v21  ;;  %v838_v23 = vadd.f32 %v1008_v22, %v954_v11 }
 0x1db   :  { %v879_v25 = vadd.f32 %v1030_v24, %v838_v23 }
 0x1dd   :  { %883 = vst [vmem:[%s1503_s5 + $0x8] sm:$0xff] %v879_v25 }

</bundles_post_ra>
